<compile_context>
chip_gen: v7x
topology: tpu7x:2x2x1
jax: 0.10.0
libtpu: 0.0.40
codegen_flags: <defaults>
</compile_context>

<pallas_src>
import jax
import jax.numpy as jnp
from jax.experimental import pallas as pl
from jax.experimental.pallas import tpu as pltpu


def _cnn2d_kernel(x_ref, a_ref, bias_ref, o_ref, xpad_ref):
    """One batch element.

    x_ref:    (Cin*H, W)          input rows (c,h) x lanes w (NCHW, flat view)
    a_ref:    (F*H_out, K*Cin*H)  circulant-embedded conv weights
    bias_ref: (F*H_out, 1)
    o_ref:    (F*H_out, W)
    xpad_ref: (Cin*H, W + K - 1)  VMEM scratch: periodically padded along W
    """
    ch, w = x_ref.shape
    wp = xpad_ref.shape[1]
    k = wp - w + 1                       # static python ints

    # Periodic padding along W done in VMEM (no padded copy in HBM).
    xpad_ref[:, :w] = x_ref[...]
    if k > 1:
        xpad_ref[:, w:] = x_ref[:, :k - 1]

    # R[(kw, c, hp), w] = x[c, hp, (w + kw) mod W]:
    # K shifted windows stacked along sublanes (aligned sublane concat).
    rmat = jnp.concatenate([xpad_ref[:, kw:kw + w] for kw in range(k)], axis=0)

    # Single MXU matmul for the whole conv, f32 accumulation.
    acc = jnp.dot(a_ref[...], rmat, preferred_element_type=jnp.float32)
    out = jnp.maximum(acc + bias_ref[...], 0.0)          # bias + ReLU
    o_ref[...] = out.astype(o_ref.dtype)


def _circulant_weight(weight, H, pbc):
    """Embed (F, Cin, K, K) conv weights as A[(f,h), (kw,c,hp)].

    A[f*H_out + h, (kw*Cin + c)*H + hp] = w[f, c, kh, kw] with kh = hp - h
    (mod H if pbc), zero where kh is outside [0, K).  Weight-only transform;
    in a real model this would be precomputed once per layer.
    """
    F, Cin, K, _ = weight.shape
    H_out = H if pbc else H - K + 1
    h = jnp.arange(H_out)[:, None]                   # output row
    hp = jnp.arange(H)[None, :]                      # input row
    kh = (hp - h) % H if pbc else hp - h
    valid = (kh >= 0) & (kh < K)
    khc = jnp.where(valid, kh, 0)
    g = weight[:, :, khc, :]                         # (F, Cin, H_out, H, K) ~ (f,c,h,hp,kw)
    g = jnp.where(valid[None, None, :, :, None], g, 0.0)
    a = jnp.transpose(g, (0, 2, 4, 1, 3))            # (f, h, kw, c, hp)
    return a.reshape(F * H_out, K * Cin * H)


def cnn2d_layer_forward(x_nchw, weight, bias, *, pbc=True):
    """Forward of CNN2d_layer: periodic_padding (if pbc) -> Conv2d(K,K) -> ReLU.

    x_nchw: (B, Cin, H, W);  weight: (F, Cin, K, K);  bias: (F,)
    Returns (B, F, H_out, W_out), H_out = H (pbc) or H-K+1, same for W.
    """
    B, Cin, H, W = x_nchw.shape
    F, Cin_w, K, K2 = weight.shape
    assert Cin_w == Cin and K == K2 and K <= H and K <= W
    H_out = H if pbc else H - K + 1
    W_out = W if pbc else W - K + 1

    # Weight / bias plumbing (tiny, depends only on the parameters).
    a_mat = _circulant_weight(weight, H, pbc).astype(x_nchw.dtype)
    bias_col = jnp.repeat(bias, H_out).reshape(F * H_out, 1).astype(jnp.float32)

    # Contiguous reshapes only (pure metadata, no HBM data movement).
    x3 = x_nchw.reshape(B, Cin * H, W)

    out3 = pl.pallas_call(
        _cnn2d_kernel,
        out_shape=jax.ShapeDtypeStruct((B, F * H_out, W), x_nchw.dtype),
        grid=(B,),
        in_specs=[
            pl.BlockSpec((None, Cin * H, W), lambda b: (b, 0, 0)),
            pl.BlockSpec((F * H_out, K * Cin * H), lambda b: (0, 0)),
            pl.BlockSpec((F * H_out, 1), lambda b: (0, 0)),
        ],
        out_specs=pl.BlockSpec((None, F * H_out, W), lambda b: (b, 0, 0)),
        scratch_shapes=[pltpu.VMEM((Cin * H, W + K - 1), x_nchw.dtype)],
        compiler_params=pltpu.CompilerParams(
            dimension_semantics=("parallel",)),
    )(x3, a_mat, bias_col)

    if not pbc:
        out3 = out3[:, :, :W_out]
    return out3.reshape(B, F, H_out, W_out)


def _reference_forward(x, weight, bias, *, pbc=True):
    """Pure-JAX reference matching the PyTorch module semantics."""
    K = weight.shape[-1]
    if pbc:
        x = jnp.concatenate([x, x[:, :, :K - 1, :]], axis=2)
        x = jnp.concatenate([x, x[:, :, :, :K - 1]], axis=3)
    H_out = x.shape[2] - K + 1
    W_out = x.shape[3] - K + 1
    patches = jnp.stack(
        [jnp.stack([x[:, :, i:i + H_out, j:j + W_out] for j in range(K)], axis=-1)
         for i in range(K)], axis=-2)                # (B, C, Ho, Wo, K, K)
    out = jnp.einsum('bchwij,fcij->bfhw', patches, weight)
    out = out + bias[None, :, None, None]
    return jnp.maximum(out, 0.0)


if __name__ == "__main__":
    # CNN2d_layer(Dp=4, K=3, F=8, layer_name='1st', act=nn.ReLU, pbc=True)
    B, Dp, H, W, K, F = 2, 4, 16, 16, 3, 8

    key = jax.random.PRNGKey(0)
    kx, kw_, kb = jax.random.split(key, 3)

    x = jax.random.normal(kx, (B, Dp, H, W), dtype=jnp.float32)        # NCHW
    weight = jax.random.normal(kw_, (F, Dp, K, K), dtype=jnp.float32) * 0.1
    bias = jax.random.normal(kb, (F,), dtype=jnp.float32) * 0.1

    # Periodic-padding path (module default).
    out = jax.block_until_ready(cnn2d_layer_forward(x, weight, bias, pbc=True))
    ref = _reference_forward(x, weight, bias, pbc=True)
    assert out.shape == (B, F, H, W), out.shape
    assert jnp.allclose(out, ref, atol=1e-4, rtol=1e-4), "pbc mismatch vs reference"

    # Non-periodic ('valid' conv) path of the same module.
    out_np = jax.block_until_ready(cnn2d_layer_forward(x, weight, bias, pbc=False))
    ref_np = _reference_forward(x, weight, bias, pbc=False)
    assert out_np.shape == (B, F, H - K + 1, W - K + 1), out_np.shape
    assert jnp.allclose(out_np, ref_np, atol=1e-4, rtol=1e-4), "no-pbc mismatch"

    print("KERNEL_OK")
</pallas_src>

<mosaic_0001>
module attributes {stable_mosaic.version = 11 : i64} {
  func.func @_cnn2d_kernel(%arg0: i32, %arg1: memref<1x64x16xf32, #tpu.memory_space<vmem>>, %arg2: memref<128x192xf32, #tpu.memory_space<vmem>>, %arg3: memref<128x1xf32, #tpu.memory_space<vmem>>, %arg4: memref<1x128x16xf32, #tpu.memory_space<vmem>>, %arg5: memref<64x18xf32, #tpu.memory_space<vmem>>) attributes {dimension_semantics = [#tpu.dimension_semantics<parallel>], iteration_bounds = array<i64: 2>, scalar_prefetch = 0 : i64, scratch_operands = 1 : i64, tpu.core_type = #tpu.core_type<tc>, window_params = [{transform_indices = @transform_0, window_bounds = array<i64: 1, 64, 16>}, {pipeline_mode = #tpu.pipeline_mode<synchronous>, transform_indices = @transform_1, window_bounds = array<i64: 128, 192>}, {pipeline_mode = #tpu.pipeline_mode<synchronous>, transform_indices = @transform_2, window_bounds = array<i64: 128, 1>}, {transform_indices = @transform_3, window_bounds = array<i64: 1, 128, 16>}]} {
    %c0 = arith.constant 0 : index
    %c0_0 = arith.constant 0 : index
    %c0_1 = arith.constant 0 : index
    %0 = vector.load %arg1[%c0, %c0_0, %c0_1] : memref<1x64x16xf32, #tpu.memory_space<vmem>>, vector<1x64x16xf32>
    %1 = vector.shape_cast %0 : vector<1x64x16xf32> to vector<64x16xf32>
    %c0_2 = arith.constant 0 : index
    %c0_3 = arith.constant 0 : index
    %2 = vector.load %arg5[%c0_2, %c0_3] : memref<64x18xf32, #tpu.memory_space<vmem>>, vector<64x16xf32>
    tpu.vector_store %arg5[%c0_2, %c0_3], %1 {strides = array<i32>} : memref<64x18xf32, #tpu.memory_space<vmem>>, vector<64x16xf32>,
    %c0_4 = arith.constant 0 : index
    %c0_5 = arith.constant 0 : index
    %c0_6 = arith.constant 0 : index
    %3 = vector.load %arg1[%c0_4, %c0_5, %c0_6] : memref<1x64x16xf32, #tpu.memory_space<vmem>>, vector<1x64x2xf32>
    %4 = vector.shape_cast %3 : vector<1x64x2xf32> to vector<64x2xf32>
    %c0_7 = arith.constant 0 : index
    %c16 = arith.constant 16 : index
    %5 = vector.load %arg5[%c0_7, %c16] : memref<64x18xf32, #tpu.memory_space<vmem>>, vector<64x2xf32>
    tpu.vector_store %arg5[%c0_7, %c16], %4 {strides = array<i32>} : memref<64x18xf32, #tpu.memory_space<vmem>>, vector<64x2xf32>,
    %c0_8 = arith.constant 0 : index
    %c0_9 = arith.constant 0 : index
    %6 = vector.load %arg5[%c0_8, %c0_9] : memref<64x18xf32, #tpu.memory_space<vmem>>, vector<64x16xf32>
    %c0_10 = arith.constant 0 : index
    %c1 = arith.constant 1 : index
    %7 = vector.load %arg5[%c0_10, %c1] : memref<64x18xf32, #tpu.memory_space<vmem>>, vector<64x16xf32>
    %c0_11 = arith.constant 0 : index
    %c2 = arith.constant 2 : index
    %8 = vector.load %arg5[%c0_11, %c2] : memref<64x18xf32, #tpu.memory_space<vmem>>, vector<64x16xf32>
    %9 = tpu.concatenate %6, %7, %8 in 0 : vector<64x16xf32>, vector<64x16xf32>, vector<64x16xf32> -> vector<192x16xf32>
    %c0_12 = arith.constant 0 : index
    %c0_13 = arith.constant 0 : index
    %10 = vector.load %arg2[%c0_12, %c0_13] : memref<128x192xf32, #tpu.memory_space<vmem>>, vector<128x192xf32>
    %cst = arith.constant dense<0.000000e+00> : vector<128x16xf32>
    %11 = tpu.matmul %10, %9, %cst {dimension_numbers = #tpu.dot_dimension_numbers<[1], [0], [0], [1], [0, 0, 1, 1], [], []>} : vector<128x192xf32>, vector<192x16xf32>, vector<128x16xf32> -> vector<128x16xf32>
    %c0_14 = arith.constant 0 : index
    %c0_15 = arith.constant 0 : index
    %12 = vector.load %arg3[%c0_14, %c0_15] : memref<128x1xf32, #tpu.memory_space<vmem>>, vector<128x1xf32>
    %13 = vector.broadcast %12 : vector<128x1xf32> to vector<128x16xf32>
    %14 = arith.addf %11, %13 : vector<128x16xf32>
    %cst_16 = arith.constant 0.000000e+00 : f32
    %15 = vector.broadcast %cst_16 : f32 to vector<128x16xf32>
    %16 = arith.maximumf %14, %15 : vector<128x16xf32>
    %c0_17 = arith.constant 0 : index
    %c0_18 = arith.constant 0 : index
    %c0_19 = arith.constant 0 : index
    %17 = vector.load %arg4[%c0_17, %c0_18, %c0_19] : memref<1x128x16xf32, #tpu.memory_space<vmem>>, vector<1x128x16xf32>
    %18 = vector.shape_cast %17 : vector<1x128x16xf32> to vector<128x16xf32>
    %19 = vector.shape_cast %16 : vector<128x16xf32> to vector<1x128x16xf32>
    tpu.vector_store %arg4[%c0_17, %c0_18, %c0_19], %19 {strides = array<i32>} : memref<1x128x16xf32, #tpu.memory_space<vmem>>, vector<1x128x16xf32>,
    return
  }
  func.func @transform_0(%arg0: i32) -> (i32, i32, i32) {
    %c0_i32 = arith.constant 0 : i32
    %c0_i32_0 = arith.constant 0 : i32
    %c0_i32_1 = arith.constant 0 : i32
    return %arg0, %c0_i32, %c0_i32_0 : i32, i32, i32
  }
  func.func @transform_1(%arg0: i32) -> (i32, i32) {
    %c0_i32 = arith.constant 0 : i32
    %c0_i32_0 = arith.constant 0 : i32
    %c0_i32_1 = arith.constant 0 : i32
    return %c0_i32, %c0_i32_0 : i32, i32
  }
  func.func @transform_2(%arg0: i32) -> (i32, i32) {
    %c0_i32 = arith.constant 0 : i32
    %c0_i32_0 = arith.constant 0 : i32
    %c0_i32_1 = arith.constant 0 : i32
    return %c0_i32, %c0_i32_0 : i32, i32
  }
  func.func @transform_3(%arg0: i32) -> (i32, i32, i32) {
    %c0_i32 = arith.constant 0 : i32
    %c0_i32_0 = arith.constant 0 : i32
    %c0_i32_1 = arith.constant 0 : i32
    return %arg0, %c0_i32, %c0_i32_0 : i32, i32, i32
  }
}

</mosaic_0001>

<bundles_post_ra>
// kernel: tpu_custom_call.1
= control target key start
LH: loop header
LB: loop body
LE: loop exit
PB: predicated region body
PF: predicated region fallthrough
CT: control target
= control target key end

     0   :  { %s887_s12 = smov 0   ;;  %s1151_s0 = inlined_call_operand.vmem [shape: f32[2,64,16], index: 0, kind: input, shape index: {}]   ;;  %s1152_s1 = inlined_call_operand.vmem [shape: f32[128,192], index: 1, kind: input, shape index: {}]   ;;  %s1153_s2 = inlined_call_operand.vmem [shape: f32[128,1], index: 2, kind: input, shape index: {}]   ;;  %s1154_s3 = inlined_call_operand.vmem [shape: f32[2,128,16], index: 3, kind: output, shape index: {}]  }
   0x1 LB: > { %s710_s13 = sadd.s32 4294967295, %s860_s12   ;;  %p714_p0 = scmp.ge.s32.totalorder %s860_s12, 1  ;;  %s860_s12 = sphi %s887_s12, %s13_s12  }
   0x2   : > { %p137_p1 = scmp.lt.s32.totalorder %s860_s12, 3 }
   0x4   : > { %p138_p2 = pnand %p714_p0, %p137_p1 }
   0x5   : > { %p161_p3 = scmp.lt.s32.totalorder (!%p138_p2), %s710_s13, 1  ;;  %vm179_vm0 = vcmask (!%p138_p2), 130048   ;;  %s862_s18 = smov (!%p138_p2), 16   ;;  %v863_v8 = vmov (!%p138_p2), 0.0|0.0   ;;  %vm228_vm1 = vcmask (!%p138_p2), 146560   ;;  %v302_v33 = vld [vmem:[%s1152_s1 + $0x8] sm:$0xff] (!%p138_p2) }
   0x6   : > { %141 = sbr.rel (%p138_p2) target bundleno = 541 (0x21d), region = 32  ;;  %739 = vmatprep.subr.bf16.mxu0 (!%p138_p2), %v863_v8  ;;  %775 = vmatprep.subr.bf16.mxu1 (!%p138_p2), %v863_v8  ;;  %s864_s19 = smov (!%p138_p2), 127   ;;  %vm429_vm2 = vcmask (!%p138_p2), 523264   ;;  %v318_v34 = vld [vmem:[%s1152_s1 + $0x88] sm:$0xff] (!%p138_p2)  ;;  %v333_v36 = vld [vmem:[%s1153_s2] sm:$0xff] (!%p138_p2)  ;;  %v866_v37 = vmov (!%p138_p2), 0  }
   0x7   : > { %s865_s20 = smov (!%p138_p2), 126   ;;  %719 = vmatprep.mubr.msk.f32.mxu0 (!%p138_p2), %vm429_vm2, %v302_v33  ;;  %727 = vmatprep.mubr.msk.f32.mxu1 (!%p138_p2), %vm429_vm2, %v318_v34  ;;  %v334_v35 = vld [vmem:[%s1153_s2 + $0x8] sm:$0xff] (!%p138_p2)  ;;  %v335_v38 = vld [vmem:[%s1153_s2 + $0x10] sm:$0xff] (!%p138_p2)  ;;  %v336_v39 = vld [vmem:[%s1153_s2 + $0x18] sm:$0xff] (!%p138_p2) }
   0x8   : > { %853 = vset.pattern.permute.xlu1 (!%p138_p2), %v866_v37  ;;  %852 = vset.pattern.permute.xlu0 (!%p138_p2), %v866_v37  ;;  %v337_v40 = vld [vmem:[%s1153_s2 + $0x20] sm:$0xff] (!%p138_p2)  ;;  %v338_v41 = vld [vmem:[%s1153_s2 + $0x28] sm:$0xff] (!%p138_p2)  ;;  %v339_v42 = vld [vmem:[%s1153_s2 + $0x30] sm:$0xff] (!%p138_p2) }
   0x9   : > { %v340_v43 = vld [vmem:[%s1153_s2 + $0x38] sm:$0xff] (!%p138_p2)  ;;  %v341_v44 = vld [vmem:[%s1153_s2 + $0x40] sm:$0xff] (!%p138_p2)  ;;  %v342_v45 = vld [vmem:[%s1153_s2 + $0x48] sm:$0xff] (!%p138_p2) }
   0xa   : > { %v343_v46 = vld [vmem:[%s1153_s2 + $0x50] sm:$0xff] (!%p138_p2)  ;;  %v344_v47 = vld [vmem:[%s1153_s2 + $0x58] sm:$0xff] (!%p138_p2)  ;;  %v345_v48 = vld [vmem:[%s1153_s2 + $0x60] sm:$0xff] (!%p138_p2) }
   0xb   : > { %v346_v49 = vld [vmem:[%s1153_s2 + $0x68] sm:$0xff] (!%p138_p2)  ;;  %v347_v50 = vld [vmem:[%s1153_s2 + $0x70] sm:$0xff] (!%p138_p2)  ;;  %v348_v51 = vld [vmem:[%s1153_s2 + $0x78] sm:$0xff] (!%p138_p2) }
   0xc   : > { %v323_v33 = vld [vmem:[%s1152_s1 + $0xb0] sm:$0xff] (!%p138_p2)  ;;  %v310_v34 = vld [vmem:[%s1152_s1 + $0x48] sm:$0xff] (!%p138_p2)  ;;  %v325_v37 = vld [vmem:[%s1152_s1 + $0xc0] sm:$0xff] (!%p138_p2) }
   0xd   : > { %s1156_s13 = smov (!%p161_p3, %s710_s13), 1 }
   0xe   : > { %s737_s14 = sshll.u32 %s1156_s13, 6 }
   0xf   : > { %s165_s17 = scalar_lea.vmem %s1151_s0, %s737_s14 }
  0x10   : > { %v190_v0 = vld [vmem:[%s165_s17 + $0x10] sm:$0xff]  ;;  %v188_v1 = vld [vmem:[%s165_s17] sm:$0xff]  ;;  %v191_v2 = vld [vmem:[%s165_s17 + $0x18] sm:$0xff] }
  0x11   : > { %208 = vrot.lane.b32.xlu1 %v190_v0, %s862_s18  ;;  %204 = vrot.lane.b32.xlu0 %v188_v1, %s862_s18  ;;  %v189_v3 = vld [vmem:[%s165_s17 + $0x8] sm:$0xff]  ;;  %182 = vst.msk [vmem:[#allocation2 + $0x10] sm:$0xff] %vm179_vm0, %v190_v0  ;;  %180 = vst.msk [vmem:[#allocation2] sm:$0xff] %vm179_vm0, %v188_v1  ;;  %v192_v5 = vld [vmem:[%s165_s17 + $0x20] sm:$0xff] }
  0x12   : > { %v193_v4 = vld [vmem:[%s165_s17 + $0x28] sm:$0xff]  ;;  %183 = vst.msk [vmem:[#allocation2 + $0x18] sm:$0xff] %vm179_vm0, %v191_v2  ;;  %v195_v6 = vld [vmem:[%s165_s17 + $0x38] sm:$0xff]  ;;  %v194_v7 = vld [vmem:[%s165_s17 + $0x30] sm:$0xff]  ;;  %s738_s17 = sshll.u32 %s1156_s13, 7 }
  0x13   : > { %181 = vst.msk [vmem:[#allocation2 + $0x8] sm:$0xff] %vm179_vm0, %v189_v3  ;;  %185 = vst.msk [vmem:[#allocation2 + $0x28] sm:$0xff] %vm179_vm0, %v193_v4 }
  0x14   : > { %184 = vst.msk [vmem:[#allocation2 + $0x20] sm:$0xff] %vm179_vm0, %v192_v5  ;;  %187 = vst.msk [vmem:[#allocation2 + $0x38] sm:$0xff] %vm179_vm0, %v195_v6 }
  0x15   : > { %186 = vst.msk [vmem:[#allocation2 + $0x30] sm:$0xff] %vm179_vm0, %v194_v7  ;;  %210 = vrot.lane.b32.xlu1 %v191_v2, %s862_s18  ;;  %206 = vrot.lane.b32.xlu0 %v189_v3, %s862_s18 }
  0x19   : > { %214 = vrot.lane.b32.xlu1 %v193_v4, %s862_s18  ;;  %212 = vrot.lane.b32.xlu0 %v192_v5, %s862_s18 }
  0x1d   : > { %218 = vrot.lane.b32.xlu1 %v195_v6, %s862_s18  ;;  %216 = vrot.lane.b32.xlu0 %v194_v7, %s862_s18 }
  0x83   : > { %v209_v9 = vpop.permute.xlu1 %208  ;;  %v205_v10 = vpop.permute.xlu0 %204 }
  0x84   : > { %231 = vst.msk [vmem:[#allocation2 + $0x10] sm:$0xff] %vm228_vm1, %v209_v9  ;;  %229 = vst.msk [vmem:[#allocation2] sm:$0xff] %vm228_vm1, %v205_v10 }
  0x87   : > { %v211_v11 = vpop.permute.xlu1 %210  ;;  %v207_v12 = vpop.permute.xlu0 %206 }
  0x88   : > { %232 = vst.msk [vmem:[#allocation2 + $0x18] sm:$0xff] %vm228_vm1, %v211_v11  ;;  %230 = vst.msk [vmem:[#allocation2 + $0x8] sm:$0xff] %vm228_vm1, %v207_v12 }
  0x8b   : > { %v215_v13 = vpop.permute.xlu1 %214  ;;  %v213_v14 = vpop.permute.xlu0 %212  ;;  %v239_v15 = vld [vmem:[#allocation2 + $0x10] sm:$0xff]  ;;  %v237_v19 = vld [vmem:[#allocation2] sm:$0xff] }
  0x8c   : > { %234 = vst.msk [vmem:[#allocation2 + $0x28] sm:$0xff] %vm228_vm1, %v215_v13  ;;  %233 = vst.msk [vmem:[#allocation2 + $0x20] sm:$0xff] %vm228_vm1, %v213_v14 }
  0x8f   : > { %v219_v16 = vpop.permute.xlu1 %218  ;;  %v217_v17 = vpop.permute.xlu0 %216  ;;  %v240_v18 = vld [vmem:[#allocation2 + $0x18] sm:$0xff]  ;;  %v238_v20 = vld [vmem:[#allocation2 + $0x8] sm:$0xff] }
  0x90   : > { %236 = vst.msk [vmem:[#allocation2 + $0x38] sm:$0xff] %vm228_vm1, %v219_v16  ;;  %235 = vst.msk [vmem:[#allocation2 + $0x30] sm:$0xff] %vm228_vm1, %v217_v17  ;;  %v817_v21 = vpack.i.bf16 %v240_v18, %v239_v15  ;;  %v812_v22 = vpack.i.bf16 %v238_v20, %v237_v19  ;;  %v740_v23 = vpack.c.bf16 %v238_v20, %v237_v19 }
  0x91   : > { %v743_v27 = vpack.c.bf16 %v240_v18, %v239_v15 }
  0x92   : > { %818 = vrot.lane.b32.xlu1 %v817_v21, %s864_s19  ;;  %813 = vrot.lane.b32.xlu0 %v812_v22, %s864_s19 }
  0x93   : > { %741 = vmatpush1.bf16.msra.mxu0 %v740_v23  ;;  %787 = vmatpush1.bf16.msra.mxu1 %v740_v23  ;;  %v241_v24 = vld [vmem:[#allocation2 + $0x20] sm:$0xff]  ;;  %v242_v25 = vld [vmem:[#allocation2 + $0x28] sm:$0xff]  ;;  %v304_v23 = vld [vmem:[%s1152_s1 + $0x18] sm:$0xff] }
  0x94   : > { %742 = vmatprep.subr.bf16.mxu0 %v863_v8  ;;  %776 = vmatprep.subr.bf16.mxu1 %v863_v8  ;;  %v822_v26 = vpack.i.bf16 %v242_v25, %v241_v24  ;;  %v746_v30 = vpack.c.bf16 %v242_v25, %v241_v24  ;;  %v320_v24 = vld [vmem:[%s1152_s1 + $0x98] sm:$0xff]  ;;  %v319_v25 = vld [vmem:[%s1152_s1 + $0x90] sm:$0xff] }
  0x96   : > { %823 = vrot.lane.b32.xlu0 %v822_v26, %s864_s19 }
  0x97   : > { %744 = vmatpush1.bf16.msra.mxu0 %v743_v27  ;;  %788 = vmatpush1.bf16.msra.mxu1 %v743_v27  ;;  %v243_v28 = vld [vmem:[#allocation2 + $0x30] sm:$0xff]  ;;  %v244_v29 = vld [vmem:[#allocation2 + $0x38] sm:$0xff]  ;;  %v322_v27 = vld [vmem:[%s1152_s1 + $0xa8] sm:$0xff] }
  0x98   : > { %745 = vmatprep.subr.bf16.mxu0 %v863_v8  ;;  %777 = vmatprep.subr.bf16.mxu1 %v863_v8  ;;  %v827_v31 = vpack.i.bf16 %v244_v29, %v243_v28  ;;  %v749_v32 = vpack.c.bf16 %v244_v29, %v243_v28  ;;  %v305_v28 = vld [vmem:[%s1152_s1 + $0x20] sm:$0xff] }
  0x99   : > { %v321_v29 = vld [vmem:[%s1152_s1 + $0xa0] sm:$0xff] }
  0x9a   : > { %828 = vrot.lane.b32.xlu1 %v827_v31, %s864_s19  ;;  %833 = vrot.lane.b32.xlu0 %v812_v22, %s865_s20  ;;  %v317_v22 = vld [vmem:[%s1152_s1 + $0x80] sm:$0xff] }
  0x9b   : > { %747 = vmatpush1.bf16.msra.mxu0 %v746_v30  ;;  %789 = vmatpush1.bf16.msra.mxu1 %v746_v30  ;;  %v308_v30 = vld [vmem:[%s1152_s1 + $0x38] sm:$0xff] }
  0x9c   : > { %748 = vmatprep.subr.bf16.mxu0 %v863_v8  ;;  %778 = vmatprep.subr.bf16.mxu1 %v863_v8 }
  0x9e   : > { %838 = vrot.lane.b32.xlu1 %v817_v21, %s865_s20  ;;  %843 = vrot.lane.b32.xlu0 %v822_v26, %s865_s20  ;;  %v301_v21 = vld [vmem:[%s1152_s1] sm:$0xff]  ;;  %v306_v26 = vld [vmem:[%s1152_s1 + $0x28] sm:$0xff] }
  0x9f   : > { %750 = vmatpush1.bf16.msra.mxu0 %v749_v32  ;;  %790 = vmatpush1.bf16.msra.mxu1 %v749_v32  ;;  %v307_v32 = vld [vmem:[%s1152_s1 + $0x30] sm:$0xff] }
  0xa0   : > { %751 = vmatprep.subr.bf16.mxu0 %v863_v8  ;;  %779 = vmatprep.subr.bf16.mxu1 %v863_v8 }
  0xa2   : > { %848 = vrot.lane.b32.xlu1 %v827_v31, %s865_s20  ;;  %351 = vperm.xlu0 %852, %v333_v36   ;;  %v324_v31 = vld [vmem:[%s1152_s1 + $0xb8] sm:$0xff]  ;;  %v309_v36 = vld [vmem:[%s1152_s1 + $0x40] sm:$0xff]  ;;  %s1111_s20 = scalar_lea.vmem %s1154_s3, %s738_s17 }
  0xa6   : > { %356 = vperm.xlu1 %853, %v334_v35   ;;  %366 = vperm.xlu0 %852, %v336_v39   ;;  %v326_v35 = vld [vmem:[%s1152_s1 + $0xc8] sm:$0xff]  ;;  %v328_v39 = vld [vmem:[%s1152_s1 + $0xd8] sm:$0xff] }
  0xaa   : > { %361 = vperm.xlu1 %853, %v335_v38   ;;  %376 = vperm.xlu0 %852, %v338_v41   ;;  %v312_v38 = vld [vmem:[%s1152_s1 + $0x58] sm:$0xff]  ;;  %v327_v41 = vld [vmem:[%s1152_s1 + $0xd0] sm:$0xff] }
  0xae   : > { %371 = vperm.xlu1 %853, %v337_v40   ;;  %386 = vperm.xlu0 %852, %v340_v43   ;;  %v311_v40 = vld [vmem:[%s1152_s1 + $0x50] sm:$0xff]  ;;  %v330_v43 = vld [vmem:[%s1152_s1 + $0xe8] sm:$0xff] }
  0xb2   : > { %381 = vperm.xlu1 %853, %v339_v42   ;;  %396 = vperm.xlu0 %852, %v342_v45   ;;  %v314_v42 = vld [vmem:[%s1152_s1 + $0x68] sm:$0xff]  ;;  %v329_v45 = vld [vmem:[%s1152_s1 + $0xe0] sm:$0xff] }
  0xb6   : > { %391 = vperm.xlu1 %853, %v341_v44   ;;  %406 = vperm.xlu0 %852, %v344_v47   ;;  %v313_v44 = vld [vmem:[%s1152_s1 + $0x60] sm:$0xff]  ;;  %v332_v47 = vld [vmem:[%s1152_s1 + $0xf8] sm:$0xff] }
  0xba   : > { %401 = vperm.xlu1 %853, %v343_v46   ;;  %416 = vperm.xlu0 %852, %v346_v49   ;;  %v316_v46 = vld [vmem:[%s1152_s1 + $0x78] sm:$0xff]  ;;  %v331_v49 = vld [vmem:[%s1152_s1 + $0xf0] sm:$0xff] }
  0xbe   : > { %411 = vperm.xlu1 %853, %v345_v48   ;;  %426 = vperm.xlu0 %852, %v348_v51   ;;  %v315_v48 = vld [vmem:[%s1152_s1 + $0x70] sm:$0xff] }
  0xc2   : > { %421 = vperm.xlu1 %853, %v347_v50  }
 0x104   : > { %v819_v52 = vpop.permute.xlu1 %818  ;;  %v814_v53 = vpop.permute.xlu0 %813 }
 0x105   : > { %v816_v54 = vunpack.i.h.bf16 %v814_v53  ;;  %v815_v55 = vunpack.i.l.bf16 %v814_v53  ;;  %v821_v56 = vunpack.i.h.bf16 %v819_v52  ;;  %v820_v57 = vunpack.i.l.bf16 %v819_v52 }
 0x107   : > { %v752_v58 = vpack.c.bf16 %v816_v54, %v815_v55  ;;  %v755_v62 = vpack.c.bf16 %v821_v56, %v820_v57 }
 0x108   : > { %v824_v59 = vpop.permute.xlu0 %823 }
 0x109   : > { %v826_v60 = vunpack.i.h.bf16 %v824_v59  ;;  %v825_v61 = vunpack.i.l.bf16 %v824_v59  ;;  %753 = vmatpush1.bf16.msra.mxu0 %v752_v58  ;;  %791 = vmatpush1.bf16.msra.mxu1 %v752_v58 }
 0x10a   : > { %754 = vmatprep.subr.bf16.mxu0 %v863_v8  ;;  %780 = vmatprep.subr.bf16.mxu1 %v863_v8 }
 0x10b   : > { %v758_v0 = vpack.c.bf16 %v826_v60, %v825_v61 }
 0x10c   : > { %v829_v63 = vpop.permute.xlu1 %828  ;;  %v834_v3 = vpop.permute.xlu0 %833 }
 0x10d   : > { %v831_v1 = vunpack.i.h.bf16 %v829_v63  ;;  %v830_v2 = vunpack.i.l.bf16 %v829_v63  ;;  %756 = vmatpush1.bf16.msra.mxu0 %v755_v62  ;;  %792 = vmatpush1.bf16.msra.mxu1 %v755_v62  ;;  %v836_v5 = vunpack.i.h.bf16 %v834_v3  ;;  %v835_v6 = vunpack.i.l.bf16 %v834_v3 }
 0x10e   : > { %757 = vmatprep.subr.bf16.mxu0 %v863_v8  ;;  %781 = vmatprep.subr.bf16.mxu1 %v863_v8 }
 0x10f   : > { %v761_v4 = vpack.c.bf16 %v831_v1, %v830_v2  ;;  %v764_v9 = vpack.c.bf16 %v836_v5, %v835_v6 }
 0x110   : > { %v839_v7 = vpop.permute.xlu1 %838  ;;  %v844_v12 = vpop.permute.xlu0 %843 }
 0x111   : > { %759 = vmatpush1.bf16.msra.mxu0 %v758_v0  ;;  %793 = vmatpush1.bf16.msra.mxu1 %v758_v0  ;;  %v841_v10 = vunpack.i.h.bf16 %v839_v7  ;;  %v840_v11 = vunpack.i.l.bf16 %v839_v7  ;;  %v846_v14 = vunpack.i.h.bf16 %v844_v12  ;;  %v845_v15 = vunpack.i.l.bf16 %v844_v12 }
 0x112   : > { %760 = vmatprep.subr.bf16.mxu0 %v863_v8  ;;  %782 = vmatprep.subr.bf16.mxu1 %v863_v8 }
 0x113   : > { %v767_v13 = vpack.c.bf16 %v841_v10, %v840_v11  ;;  %v770_v17 = vpack.c.bf16 %v846_v14, %v845_v15 }
 0x114   : > { %v849_v16 = vpop.permute.xlu1 %848 }
 0x115   : > { %762 = vmatpush1.bf16.msra.mxu0 %v761_v4  ;;  %794 = vmatpush1.bf16.msra.mxu1 %v761_v4  ;;  %v851_v18 = vunpack.i.h.bf16 %v849_v16  ;;  %v850_v19 = vunpack.i.l.bf16 %v849_v16 }
 0x116   : > { %763 = vmatprep.subr.bf16.mxu0 %v863_v8  ;;  %783 = vmatprep.subr.bf16.mxu1 %v863_v8 }
 0x117   : > { %v773_v20 = vpack.c.bf16 %v851_v18, %v850_v19 }
 0x119   : > { %765 = vmatpush1.bf16.msra.mxu0 %v764_v9  ;;  %795 = vmatpush1.bf16.msra.mxu1 %v764_v9 }
 0x11a   : > { %766 = vmatprep.subr.bf16.mxu0 %v863_v8  ;;  %784 = vmatprep.subr.bf16.mxu1 %v863_v8 }
 0x11d   : > { %768 = vmatpush1.bf16.msra.mxu0 %v767_v13  ;;  %796 = vmatpush1.bf16.msra.mxu1 %v767_v13 }
 0x11e   : > { %769 = vmatprep.subr.bf16.mxu0 %v863_v8  ;;  %785 = vmatprep.subr.bf16.mxu1 %v863_v8 }
 0x121   : > { %771 = vmatpush1.bf16.msra.mxu0 %v770_v17  ;;  %797 = vmatpush1.bf16.msra.mxu1 %v770_v17  ;;  %v352_v51 = vpop.permute.xlu0 %351 }
 0x122   : > { %772 = vmatprep.subr.bf16.mxu0 %v863_v8  ;;  %786 = vmatprep.subr.bf16.mxu1 %v863_v8  ;;  %v303_v8 = vld [vmem:[%s1152_s1 + $0x10] sm:$0xff] }
 0x125   : > { %774 = vmatpush1.bf16.msra.mxu0 %v773_v20  ;;  %798 = vmatpush1.bf16.msra.mxu1 %v773_v20  ;;  %v357_v50 = vpop.permute.xlu1 %356  ;;  %v367_v53 = vpop.permute.xlu0 %366 }
 0x128   : > { %543 = vmatmul.mubr.f32.vlgmr.msra.gmra.mrb[0].mxu0 %v301_v21  ;;  %583 = vmatmul.mubr.f32.vlgmr.msra.gmra.mrb[0].mxu1 %v317_v22 }
 0x129   : > { %720 = vmatprep.mubr.msk.f32.mxu0 %vm429_vm2, %v304_v23  ;;  %728 = vmatprep.mubr.msk.f32.mxu1 %vm429_vm2, %v320_v24  ;;  %v362_v52 = vpop.permute.xlu1 %361  ;;  %v1101_v55 = vpop.permute.xlu0 %376 }
 0x12c   : > { %548 = vmatmul.mubr.f32.gmra.mrb[2].mxu0 %v303_v8  ;;  %588 = vmatmul.mubr.f32.gmra.mrb[2].mxu1 %v319_v25 }
 0x12d   : > { %721 = vmatprep.mubr.msk.f32.mxu0 %vm429_vm2, %v306_v26  ;;  %729 = vmatprep.mubr.msk.f32.mxu1 %vm429_vm2, %v322_v27  ;;  %v372_v54 = vpop.permute.xlu1 %371  ;;  %v1105_v57 = vpop.permute.xlu0 %386 }
 0x130   : > { %553 = vmatmul.mubr.f32.gmra.mrb[4].mxu0 %v305_v28  ;;  %593 = vmatmul.mubr.f32.gmra.mrb[4].mxu1 %v321_v29 }
 0x131   : > { %722 = vmatprep.mubr.msk.f32.mxu0 %vm429_vm2, %v308_v30  ;;  %730 = vmatprep.mubr.msk.f32.mxu1 %vm429_vm2, %v324_v31  ;;  %v1103_v56 = vpop.permute.xlu1 %381  ;;  %v397_v1 = vpop.permute.xlu0 %396 }
 0x134   : > { %558 = vmatmul.mubr.f32.gmra.mrb[6].mxu0 %v307_v32  ;;  %598 = vmatmul.mubr.f32.gmra.mrb[6].mxu1 %v323_v33 }
 0x135   : > { %723 = vmatprep.mubr.msk.f32.mxu0 %vm429_vm2, %v310_v34  ;;  %731 = vmatprep.mubr.msk.f32.mxu1 %vm429_vm2, %v326_v35  ;;  %v392_v58 = vpop.permute.xlu1 %391  ;;  %v407_v20 = vpop.permute.xlu0 %406 }
 0x138   : > { %563 = vmatmul.mubr.f32.gmra.mrb[8].mxu0 %v309_v36  ;;  %603 = vmatmul.mubr.f32.gmra.mrb[8].mxu1 %v325_v37 }
 0x139   : > { %724 = vmatprep.mubr.msk.f32.mxu0 %vm429_vm2, %v312_v38  ;;  %732 = vmatprep.mubr.msk.f32.mxu1 %vm429_vm2, %v328_v39  ;;  %v402_v11 = vpop.permute.xlu1 %401  ;;  %v417_v37 = vpop.permute.xlu0 %416 }
 0x13c   : > { %568 = vmatmul.mubr.f32.gmra.mrb[10].mxu0 %v311_v40  ;;  %608 = vmatmul.mubr.f32.gmra.mrb[10].mxu1 %v327_v41 }
 0x13d   : > { %725 = vmatprep.mubr.msk.f32.mxu0 %vm429_vm2, %v314_v42  ;;  %733 = vmatprep.mubr.msk.f32.mxu1 %vm429_vm2, %v330_v43  ;;  %v412_v28 = vpop.permute.xlu1 %411 }
 0x140   : > { %573 = vmatmul.mubr.f32.gmra.mrb[12].mxu0 %v313_v44  ;;  %613 = vmatmul.mubr.f32.gmra.mrb[12].mxu1 %v329_v45 }
 0x141   : > { %726 = vmatprep.mubr.msk.f32.mxu0 %vm429_vm2, %v316_v46  ;;  %734 = vmatprep.mubr.msk.f32.mxu1 %vm429_vm2, %v332_v47  ;;  %v422_v46 = vpop.permute.xlu1 %421 }
 0x144   : > { %578 = vmatmul.mubr.f32.gmra.mrb[14].mxu0 %v315_v48  ;;  %618 = vmatmul.mubr.f32.gmra.mrb[14].mxu1 %v331_v49 }
 0x1fb   : > { %v544_v59 = vpop.f32.mrb[0].mxu0  ;;  %v584_v60 = vpop.f32.mrb[0].mxu1 }
 0x1fc   : > { %v545_v61 = vadd.f32 %v544_v59, %v352_v51  ;;  %v585_v62 = vadd.f32 %v584_v60, %v392_v58  ;;  %v546_v63 = vpop.f32.mrb[1].mxu0  ;;  %v586_v0 = vpop.f32.mrb[1].mxu1 }
 0x1fe   : > { %v623_v2 = vmax.f32 %v545_v61, 0.0  ;;  %v631_v3 = vmax.f32 %v585_v62, 0.0 }
 0x1ff   : > { %v549_v4 = vpop.f32.mrb[2].mxu0  ;;  %v589_v5 = vpop.f32.mrb[2].mxu1 }
 0x200   : > { %639 = vst.msk [vmem:[%s1111_s20] sm:$0xff] %vm179_vm0, %v623_v2  ;;  %647 = vst.msk [vmem:[%s1111_s20 + $0x40] sm:$0xff] %vm179_vm0, %v631_v3  ;;  %v550_v6 = vadd.f32 %v549_v4, %v357_v50  ;;  %v590_v7 = vadd.f32 %v589_v5, %v397_v1  ;;  %v551_v9 = vpop.f32.mrb[3].mxu0  ;;  %v591_v10 = vpop.f32.mrb[3].mxu1 }
 0x202   : > { %v624_v12 = vmax.f32 %v550_v6, 0.0  ;;  %v632_v13 = vmax.f32 %v590_v7, 0.0 }
 0x203   : > { %v554_v14 = vpop.f32.mrb[4].mxu0  ;;  %v594_v15 = vpop.f32.mrb[4].mxu1 }
 0x204   : > { %640 = vst.msk [vmem:[%s1111_s20 + $0x8] sm:$0xff] %vm179_vm0, %v624_v12  ;;  %648 = vst.msk [vmem:[%s1111_s20 + $0x48] sm:$0xff] %vm179_vm0, %v632_v13  ;;  %v555_v16 = vadd.f32 %v554_v14, %v362_v52  ;;  %v595_v17 = vadd.f32 %v594_v15, %v402_v11  ;;  %v556_v18 = vpop.f32.mrb[5].mxu0  ;;  %v596_v19 = vpop.f32.mrb[5].mxu1 }
 0x206   : > { %v625_v21 = vmax.f32 %v555_v16, 0.0  ;;  %v633_v22 = vmax.f32 %v595_v17, 0.0 }
 0x207   : > { %v559_v23 = vpop.f32.mrb[6].mxu0  ;;  %v599_v24 = vpop.f32.mrb[6].mxu1 }
 0x208   : > { %641 = vst.msk [vmem:[%s1111_s20 + $0x10] sm:$0xff] %vm179_vm0, %v625_v21  ;;  %649 = vst.msk [vmem:[%s1111_s20 + $0x50] sm:$0xff] %vm179_vm0, %v633_v22  ;;  %v560_v8 = vadd.f32 %v559_v23, %v367_v53  ;;  %v600_v25 = vadd.f32 %v599_v24, %v407_v20  ;;  %v561_v26 = vpop.f32.mrb[7].mxu0  ;;  %v601_v27 = vpop.f32.mrb[7].mxu1 }
 0x20a   : > { %v626_v29 = vmax.f32 %v560_v8, 0.0  ;;  %v634_v30 = vmax.f32 %v600_v25, 0.0 }
 0x20b   : > { %v564_v31 = vpop.f32.mrb[8].mxu0  ;;  %v604_v32 = vpop.f32.mrb[8].mxu1 }
 0x20c   : > { %642 = vst.msk [vmem:[%s1111_s20 + $0x18] sm:$0xff] %vm179_vm0, %v626_v29  ;;  %650 = vst.msk [vmem:[%s1111_s20 + $0x58] sm:$0xff] %vm179_vm0, %v634_v30  ;;  %v565_v33 = vadd.f32 %v564_v31, %v372_v54  ;;  %v605_v34 = vadd.f32 %v604_v32, %v412_v28  ;;  %v566_v35 = vpop.f32.mrb[9].mxu0  ;;  %v606_v36 = vpop.f32.mrb[9].mxu1 }
 0x20e   : > { %v627_v38 = vmax.f32 %v565_v33, 0.0  ;;  %v635_v39 = vmax.f32 %v605_v34, 0.0 }
 0x20f   : > { %v569_v40 = vpop.f32.mrb[10].mxu0  ;;  %v609_v41 = vpop.f32.mrb[10].mxu1 }
 0x210   : > { %643 = vst.msk [vmem:[%s1111_s20 + $0x20] sm:$0xff] %vm179_vm0, %v627_v38  ;;  %651 = vst.msk [vmem:[%s1111_s20 + $0x60] sm:$0xff] %vm179_vm0, %v635_v39  ;;  %v570_v42 = vadd.f32 %v569_v40, %v1101_v55  ;;  %v610_v43 = vadd.f32 %v609_v41, %v417_v37  ;;  %v571_v44 = vpop.f32.mrb[11].mxu0  ;;  %v611_v45 = vpop.f32.mrb[11].mxu1 }
 0x211   : > { %v427_v55 = vpop.permute.xlu0 %426 }
 0x212   : > { %v628_v47 = vmax.f32 %v570_v42, 0.0  ;;  %v636_v48 = vmax.f32 %v610_v43, 0.0 }
 0x213   : > { %v574_v49 = vpop.f32.mrb[12].mxu0  ;;  %v614_v50 = vpop.f32.mrb[12].mxu1 }
 0x214   : > { %644 = vst.msk [vmem:[%s1111_s20 + $0x28] sm:$0xff] %vm179_vm0, %v628_v47  ;;  %652 = vst.msk [vmem:[%s1111_s20 + $0x68] sm:$0xff] %vm179_vm0, %v636_v48  ;;  %v575_v51 = vadd.f32 %v574_v49, %v1103_v56  ;;  %v615_v52 = vadd.f32 %v614_v50, %v422_v46  ;;  %v576_v53 = vpop.f32.mrb[13].mxu0  ;;  %v616_v54 = vpop.f32.mrb[13].mxu1 }
 0x216   : > { %v629_v58 = vmax.f32 %v575_v51, 0.0  ;;  %v637_v59 = vmax.f32 %v615_v52, 0.0 }
 0x217   : > { %v579_v60 = vpop.f32.mrb[14].mxu0  ;;  %v619_v61 = vpop.f32.mrb[14].mxu1 }
 0x218   : > { %645 = vst.msk [vmem:[%s1111_s20 + $0x30] sm:$0xff] %vm179_vm0, %v629_v58  ;;  %653 = vst.msk [vmem:[%s1111_s20 + $0x70] sm:$0xff] %vm179_vm0, %v637_v59  ;;  %v580_v62 = vadd.f32 %v579_v60, %v1105_v57  ;;  %v620_v63 = vadd.f32 %v619_v61, %v427_v55  ;;  %v581_v0 = vpop.f32.mrb[15].mxu0  ;;  %v621_v1 = vpop.f32.mrb[15].mxu1 }
 0x21a   : > { %v630_v56 = vmax.f32 %v580_v62, 0.0  ;;  %v638_v2 = vmax.f32 %v620_v63, 0.0 }
 0x21c   : > { %646 = vst.msk [vmem:[%s1111_s20 + $0x38] sm:$0xff] %vm179_vm0, %v630_v56  ;;  %654 = vst.msk [vmem:[%s1111_s20 + $0x78] sm:$0xff] %vm179_vm0, %v638_v2 }
 0x21d PF: > { %s13_s12 = sadd.s32 1, %s860_s12  }
 0x21e   : > { %p10_p4 = scmp.ge.s32.totalorder %s13_s12, 4  }
 0x220   :  { %12 = sbr.rel (!%p10_p4) target bundleno = 1 (0x1), region = 62 }

</bundles_post_ra>
